<compile_context>
chip_gen: v7x
topology: tpu7x:2x2x1
jax: 0.10.0
libtpu: 0.0.40
codegen_flags: <defaults>
</compile_context>

<pallas_src>
import functools

import jax
import jax.numpy as jnp
from jax.experimental import pallas as pl
from jax.experimental.pallas import tpu as pltpu


def _ceil_to(x, m):
    return -(-x // m) * m


def _sobel_loss_kernel(pred_ref, gt_ref, sumsq_ref, cnt_ref,
                       psum_ref, gsum_ref, *, H, W, HW_pad, num_cb, threshold):
    # grid = (N, num_cb): N is 'parallel', the channel-block axis is 'arbitrary'.
    cb = pl.program_id(1)
    HW = H * W

    # One lane-dense (Cb, H*W) channel block of one image; fold the channels
    # (same-3x3-kernel-per-channel conv == conv of the channel-sum image).
    p = jnp.sum(pred_ref[0], axis=0, keepdims=True)   # (1, HW_pad) f32
    g = jnp.sum(gt_ref[0], axis=0, keepdims=True)

    @pl.when(cb == 0)
    def _init():
        psum_ref[...] = p
        gsum_ref[...] = g
        sumsq_ref[...] = jnp.zeros_like(sumsq_ref)
        cnt_ref[...] = jnp.zeros_like(cnt_ref)

    @pl.when(cb != 0)
    def _accumulate():
        psum_ref[...] += p
        gsum_ref[...] += g

    @pl.when(cb == num_cb - 1)
    def _finalize():
        # Flat row-major border masks (built only in the once-per-image finalize).
        idx = jax.lax.broadcasted_iota(jnp.int32, (1, HW_pad), 1)
        col = idx % W
        not_col0 = col != 0              # pixel has a left neighbour
        not_colL = col != W - 1          # pixel has a right neighbour
        not_row0 = idx >= W              # pixel has an upper neighbour
        not_rowL = idx < (H - 1) * W     # pixel has a lower neighbour

        def shift(x, amt, keep):
            # x[i - amt] with zero 'same' padding; amt is taken mod HW_pad so
            # only non-negative rotation amounts are emitted (XLU lane rotate).
            return jnp.where(keep, pltpu.roll(x, amt % HW_pad, axis=1), 0.0)

        def sobel_sq(img):
            # Separable 3x3 Sobel as cross-correlation (matches torch conv2d):
            #   Kx = [1,2,1]^T (x) [1,0,-1],   Ky = [1,0,-1]^T (x) [1,2,1]
            left = shift(img, 1, not_col0)     # img[r, c-1]
            right = shift(img, -1, not_colL)   # img[r, c+1]
            dxh = left - right                 # horizontal diff
            smh = left + 2.0 * img + right     # horizontal smooth
            sx = shift(dxh, W, not_row0) + 2.0 * dxh + shift(dxh, -W, not_rowL)
            sy = shift(smh, W, not_row0) - shift(smh, -W, not_rowL)
            return sx * sx + sy * sy

        ps = sobel_sq(psum_ref[...])
        gs = sobel_sq(gsum_ref[...])
        mask = ps < threshold
        if HW_pad != HW:                  # drop the lane-alignment padding tail
            mask = jnp.logical_and(mask, idx < HW)
        mf = mask.astype(jnp.float32)
        diff = ps - gs
        # Per-batch partial sums; the tiny global mean is taken in the wrapper.
        sumsq_ref[...] += jnp.sum(mf * diff * diff)
        cnt_ref[...] += jnp.sum(mask.astype(jnp.int32))


def sobel_consistency_loss(pred_depth, gt_depth, threshold=1.0):
    """pred_depth, gt_depth: (N, C, H, W) float (NCHW). Returns scalar f32."""
    N, C, H, W = pred_depth.shape
    assert gt_depth.shape == pred_depth.shape
    HW = H * W
    HW_pad = _ceil_to(HW, 128)

    pred_flat = pred_depth.astype(jnp.float32).reshape(N, C, HW)
    gt_flat = gt_depth.astype(jnp.float32).reshape(N, C, HW)
    if HW_pad != HW:
        # Lane-alignment zero tail (only when H*W is not already a multiple of
        # 128); padded positions are masked out of the loss inside the kernel.
        pad = ((0, 0), (0, 0), (0, HW_pad - HW))
        pred_flat = jnp.pad(pred_flat, pad)
        gt_flat = jnp.pad(gt_flat, pad)

    # ---- per-chip VMEM budget & block sizing (lane/sublane padding included).
    try:
        vmem_cap = int(pltpu.get_tpu_info().vmem_capacity_bytes)
    except Exception:
        vmem_cap = 128 << 20
    budget = int(vmem_cap * 0.6)   # headroom for Mosaic-internal scratch

    def footprint(cb, n_buf):
        in_block = _ceil_to(cb, 8) * HW_pad * 4     # one pipelined input block
        scratch = 2 * 8 * HW_pad * 4                # two (1, HW_pad) channel sums
        outs = 2 * 2 * 8 * 128 * 4                  # tiny (1,1,1) output blocks
        return 2 * n_buf * in_block + scratch + outs

    # Cb must satisfy the (8,128) block constraint on the second-to-last dim:
    # either a multiple of 8 or the full channel extent.
    candidates = [d for d in range(1, C + 1)
                  if C % d == 0 and (d == C or d % 8 == 0)]
    Cb = min(candidates)
    for d in sorted(candidates, reverse=True):
        if footprint(d, 2) <= budget:
            Cb = d
            break
    num_cb = C // Cb

    # Deeper pipelining only pays off for small blocks on a long grid.
    block_bytes = _ceil_to(Cb, 8) * HW_pad * 4
    n_buf = 3 if (N * num_cb >= 4 and block_bytes <= (256 << 10)
                  and footprint(Cb, 3) <= budget) else 2

    vmem_limit = int(min(max(footprint(Cb, n_buf) + (4 << 20), 16 << 20),
                         int(vmem_cap * 0.9)))

    kernel = functools.partial(_sobel_loss_kernel, H=H, W=W, HW_pad=HW_pad,
                               num_cb=num_cb, threshold=float(threshold))

    spec_kwargs = {"pipeline_mode": pl.Buffered(3)} if n_buf == 3 else {}
    in_spec = pl.BlockSpec((1, Cb, HW_pad), lambda n, cb: (n, cb, 0),
                           **spec_kwargs)

    sumsq, cnt = pl.pallas_call(
        kernel,
        out_shape=(jax.ShapeDtypeStruct((N, 1, 1), jnp.float32),
                   jax.ShapeDtypeStruct((N, 1, 1), jnp.int32)),
        grid_spec=pltpu.PrefetchScalarGridSpec(
            num_scalar_prefetch=0,
            grid=(N, num_cb),
            in_specs=[in_spec, in_spec],
            out_specs=(
                pl.BlockSpec((1, 1, 1), lambda n, cb: (n, 0, 0)),
                pl.BlockSpec((1, 1, 1), lambda n, cb: (n, 0, 0)),
            ),
            scratch_shapes=[
                pltpu.VMEM((1, HW_pad), jnp.float32),   # pred channel-sum
                pltpu.VMEM((1, HW_pad), jnp.float32),   # gt channel-sum
            ],
        ),
        compiler_params=pltpu.CompilerParams(
            dimension_semantics=("parallel", "arbitrary"),
            vmem_limit_bytes=vmem_limit,
        ),
    )(pred_flat, gt_flat)

    # nn.MSELoss over the masked elements == sum / count (NaN for an empty
    # selection, matching PyTorch's mean over zero elements).
    return jnp.sum(sumsq) / jnp.sum(cnt)


# ---------------- pure-JAX reference (for correctness check only) -----------
_KX = ((1.0, 0.0, -1.0),
       (2.0, 0.0, -2.0),
       (1.0, 0.0, -1.0))
_KY = ((1.0, 2.0, 1.0),
       (0.0, 0.0, 0.0),
       (-1.0, -2.0, -1.0))


def _get_sobel_ref(depth):
    n = depth.shape[1]
    kx = jnp.array(_KX, jnp.float32)
    ky = jnp.array(_KY, jnp.float32)
    wx = jnp.broadcast_to(kx, (1, n, 3, 3))
    wy = jnp.broadcast_to(ky, (1, n, 3, 3))
    dn = jax.lax.conv_dimension_numbers(depth.shape, wx.shape,
                                        ("NCHW", "OIHW", "NCHW"))
    sx = jax.lax.conv_general_dilated(depth, wx, (1, 1), "SAME",
                                      dimension_numbers=dn)
    sy = jax.lax.conv_general_dilated(depth, wy, (1, 1), "SAME",
                                      dimension_numbers=dn)
    return sx ** 2 + sy ** 2


def _loss_ref(pred, gt, threshold=1.0):
    ps = _get_sobel_ref(pred)
    gs = _get_sobel_ref(gt)
    mask = ps < threshold
    diff = jnp.where(mask, ps - gs, 0.0)
    return jnp.sum(diff * diff) / jnp.sum(mask.astype(jnp.float32))


if __name__ == "__main__":
    key = jax.random.PRNGKey(0)
    k1, k2 = jax.random.split(key)
    N, C, H, W = 2, 4, 16, 16
    # Scale inputs so a healthy fraction of sobel magnitudes fall below the
    # threshold (avoids an empty mask, which would be NaN by definition).
    pred = 0.1 * jax.random.normal(k1, (N, C, H, W), dtype=jnp.float32)
    gt = pred + 0.05 * jax.random.normal(k2, (N, C, H, W), dtype=jnp.float32)

    out = jax.block_until_ready(sobel_consistency_loss(pred, gt, threshold=1.0))
    ref = jax.block_until_ready(_loss_ref(pred, gt, threshold=1.0))

    assert jnp.isfinite(out), f"non-finite kernel output: {out}"
    assert jnp.allclose(out, ref, rtol=1e-3, atol=1e-6), (out, ref)

    print("KERNEL_OK")
</pallas_src>

<mosaic_0001>
module attributes {stable_mosaic.version = 11 : i64} {
  func.func @_sobel_loss_kernel(%arg0: i32, %arg1: i32, %arg2: memref<1x4x256xf32, #tpu.memory_space<vmem>>, %arg3: memref<1x4x256xf32, #tpu.memory_space<vmem>>, %arg4: memref<1x1x1xf32, #tpu.memory_space<vmem>>, %arg5: memref<1x1x1xi32, #tpu.memory_space<vmem>>, %arg6: memref<1x256xf32, #tpu.memory_space<vmem>>, %arg7: memref<1x256xf32, #tpu.memory_space<vmem>>) attributes {dimension_semantics = [#tpu.dimension_semantics<parallel>, #tpu.dimension_semantics<arbitrary>], iteration_bounds = array<i64: 2, 1>, scalar_prefetch = 0 : i64, scratch_operands = 2 : i64, tpu.core_type = #tpu.core_type<tc>, window_params = [{transform_indices = @transform_0, window_bounds = array<i64: 1, 4, 256>}, {transform_indices = @transform_1, window_bounds = array<i64: 1, 4, 256>}, {transform_indices = @transform_2, window_bounds = array<i64: 1, 1, 1>}, {transform_indices = @transform_3, window_bounds = array<i64: 1, 1, 1>}]} {
    %c0 = arith.constant 0 : index
    %c0_0 = arith.constant 0 : index
    %c0_1 = arith.constant 0 : index
    %0 = vector.load %arg2[%c0, %c0_0, %c0_1] : memref<1x4x256xf32, #tpu.memory_space<vmem>>, vector<1x4x256xf32>
    %1 = vector.shape_cast %0 : vector<1x4x256xf32> to vector<4x256xf32>
    %cst = arith.constant dense<0.000000e+00> : vector<256xf32>
    %2 = vector.multi_reduction <add>, %1, %cst [0] : vector<4x256xf32> to vector<256xf32>
    %3 = vector.shape_cast %2 : vector<256xf32> to vector<1x256xf32>
    %c0_2 = arith.constant 0 : index
    %c0_3 = arith.constant 0 : index
    %c0_4 = arith.constant 0 : index
    %4 = vector.load %arg3[%c0_2, %c0_3, %c0_4] : memref<1x4x256xf32, #tpu.memory_space<vmem>>, vector<1x4x256xf32>
    %5 = vector.shape_cast %4 : vector<1x4x256xf32> to vector<4x256xf32>
    %cst_5 = arith.constant dense<0.000000e+00> : vector<256xf32>
    %6 = vector.multi_reduction <add>, %5, %cst_5 [0] : vector<4x256xf32> to vector<256xf32>
    %7 = vector.shape_cast %6 : vector<256xf32> to vector<1x256xf32>
    %c0_i32 = arith.constant 0 : i32
    %8 = arith.cmpi eq, %arg1, %c0_i32 : i32
    %9 = arith.extui %8 : i1 to i32
    %c0_i32_6 = arith.constant 0 : i32
    %10 = arith.cmpi ne, %9, %c0_i32_6 : i32
    scf.if %10 {
      %c0_11 = arith.constant 0 : index
      %c0_12 = arith.constant 0 : index
      %17 = vector.load %arg6[%c0_11, %c0_12] : memref<1x256xf32, #tpu.memory_space<vmem>>, vector<1x256xf32>
      tpu.vector_store %arg6[%c0_11, %c0_12], %3 {strides = array<i32>} : memref<1x256xf32, #tpu.memory_space<vmem>>, vector<1x256xf32>,
      %c0_13 = arith.constant 0 : index
      %c0_14 = arith.constant 0 : index
      %18 = vector.load %arg7[%c0_13, %c0_14] : memref<1x256xf32, #tpu.memory_space<vmem>>, vector<1x256xf32>
      tpu.vector_store %arg7[%c0_13, %c0_14], %7 {strides = array<i32>} : memref<1x256xf32, #tpu.memory_space<vmem>>, vector<1x256xf32>,
      %cst_15 = arith.constant 0.000000e+00 : f32
      %19 = vector.broadcast %cst_15 : f32 to vector<1x1x1xf32>
      %c0_16 = arith.constant 0 : index
      %c0_17 = arith.constant 0 : index
      %c0_18 = arith.constant 0 : index
      %20 = vector.load %arg4[%c0_16, %c0_17, %c0_18] : memref<1x1x1xf32, #tpu.memory_space<vmem>>, vector<1x1x1xf32>
      tpu.vector_store %arg4[%c0_16, %c0_17, %c0_18], %19 {strides = array<i32>} : memref<1x1x1xf32, #tpu.memory_space<vmem>>, vector<1x1x1xf32>,
      %c0_i32_19 = arith.constant 0 : i32
      %21 = vector.broadcast %c0_i32_19 : i32 to vector<1x1x1xi32>
      %c0_20 = arith.constant 0 : index
      %c0_21 = arith.constant 0 : index
      %c0_22 = arith.constant 0 : index
      %22 = vector.load %arg5[%c0_20, %c0_21, %c0_22] : memref<1x1x1xi32, #tpu.memory_space<vmem>>, vector<1x1x1xi32>
      tpu.vector_store %arg5[%c0_20, %c0_21, %c0_22], %21 {strides = array<i32>} : memref<1x1x1xi32, #tpu.memory_space<vmem>>, vector<1x1x1xi32>,
    } else {
    }
    %c0_i32_7 = arith.constant 0 : i32
    %11 = arith.cmpi ne, %arg1, %c0_i32_7 : i32
    %12 = arith.extui %11 : i1 to i32
    %c0_i32_8 = arith.constant 0 : i32
    %13 = arith.cmpi ne, %12, %c0_i32_8 : i32
    scf.if %13 {
      %c0_11 = arith.constant 0 : index
      %c0_12 = arith.constant 0 : index
      %17 = vector.load %arg6[%c0_11, %c0_12] : memref<1x256xf32, #tpu.memory_space<vmem>>, vector<1x256xf32>
      %18 = arith.addf %17, %3 : vector<1x256xf32>
      %c0_13 = arith.constant 0 : index
      %c0_14 = arith.constant 0 : index
      %19 = vector.load %arg6[%c0_13, %c0_14] : memref<1x256xf32, #tpu.memory_space<vmem>>, vector<1x256xf32>
      tpu.vector_store %arg6[%c0_13, %c0_14], %18 {strides = array<i32>} : memref<1x256xf32, #tpu.memory_space<vmem>>, vector<1x256xf32>,
      %c0_15 = arith.constant 0 : index
      %c0_16 = arith.constant 0 : index
      %20 = vector.load %arg7[%c0_15, %c0_16] : memref<1x256xf32, #tpu.memory_space<vmem>>, vector<1x256xf32>
      %21 = arith.addf %20, %7 : vector<1x256xf32>
      %c0_17 = arith.constant 0 : index
      %c0_18 = arith.constant 0 : index
      %22 = vector.load %arg7[%c0_17, %c0_18] : memref<1x256xf32, #tpu.memory_space<vmem>>, vector<1x256xf32>
      tpu.vector_store %arg7[%c0_17, %c0_18], %21 {strides = array<i32>} : memref<1x256xf32, #tpu.memory_space<vmem>>, vector<1x256xf32>,
    } else {
    }
    %c0_i32_9 = arith.constant 0 : i32
    %14 = arith.cmpi eq, %arg1, %c0_i32_9 : i32
    %15 = arith.extui %14 : i1 to i32
    %c0_i32_10 = arith.constant 0 : i32
    %16 = arith.cmpi ne, %15, %c0_i32_10 : i32
    scf.if %16 {
      %17 = tpu.iota {dimensions = array<i32: 1>} : vector<1x256xi32>
      %c16_i32 = arith.constant 16 : i32
      %c0_i32_11 = arith.constant 0 : i32
      %18 = arith.cmpi eq, %c16_i32, %c0_i32_11 : i32
      %c1_i32 = arith.constant 1 : i32
      %19 = arith.select %18, %c1_i32, %c16_i32 : i32
      %20 = vector.broadcast %19 : i32 to vector<1x256xi32>
      %21 = arith.remsi %17, %20 : vector<1x256xi32>
      %c0_i32_12 = arith.constant 0 : i32
      %22 = vector.broadcast %c0_i32_12 : i32 to vector<1x256xi32>
      %23 = arith.cmpi ne, %21, %22 : vector<1x256xi32>
      %c0_i32_13 = arith.constant 0 : i32
      %24 = vector.broadcast %c0_i32_13 : i32 to vector<1x256xi32>
      %25 = arith.cmpi slt, %21, %24 : vector<1x256xi32>
      %c0_i32_14 = arith.constant 0 : i32
      %26 = arith.cmpi slt, %19, %c0_i32_14 : i32
      %27 = vector.broadcast %26 : i1 to vector<1x256xi1>
      %28 = vector.broadcast %27 : vector<1x256xi1> to vector<1x256xi1>
      %29 = arith.xori %25, %28 : vector<1x256xi1>
      %30 = arith.andi %29, %23 : vector<1x256xi1>
      %31 = vector.broadcast %19 : i32 to vector<1x256xi32>
      %32 = arith.addi %21, %31 : vector<1x256xi32>
      %33 = arith.select %30, %32, %21 : vector<1x256xi1>, vector<1x256xi32>
      %c0_i32_15 = arith.constant 0 : i32
      %34 = vector.broadcast %c0_i32_15 : i32 to vector<1x256xi32>
      %35 = arith.cmpi ne, %33, %34 : vector<1x256xi32>
      %c15_i32 = arith.constant 15 : i32
      %36 = vector.broadcast %c15_i32 : i32 to vector<1x256xi32>
      %37 = arith.cmpi ne, %33, %36 : vector<1x256xi32>
      %c16_i32_16 = arith.constant 16 : i32
      %38 = vector.broadcast %c16_i32_16 : i32 to vector<1x256xi32>
      %39 = arith.cmpi sge, %17, %38 : vector<1x256xi32>
      %c240_i32 = arith.constant 240 : i32
      %40 = vector.broadcast %c240_i32 : i32 to vector<1x256xi32>
      %41 = arith.cmpi slt, %17, %40 : vector<1x256xi32>
      %c0_17 = arith.constant 0 : index
      %c0_18 = arith.constant 0 : index
      %42 = vector.load %arg6[%c0_17, %c0_18] : memref<1x256xf32, #tpu.memory_space<vmem>>, vector<1x256xf32>
      %c1_i32_19 = arith.constant 1 : i32
      %43 = tpu.dynamic_rotate %42 by %c1_i32_19 dim 1 : vector<1x256xf32>, i32 -> vector<1x256xf32>
      %cst_20 = arith.constant 0.000000e+00 : f32
      %44 = vector.broadcast %cst_20 : f32 to vector<1x256xf32>
      %45 = arith.select %35, %43, %44 : vector<1x256xi1>, vector<1x256xf32>
      %c255_i32 = arith.constant 255 : i32
      %46 = tpu.dynamic_rotate %42 by %c255_i32 dim 1 : vector<1x256xf32>, i32 -> vector<1x256xf32>
      %cst_21 = arith.constant 0.000000e+00 : f32
      %47 = vector.broadcast %cst_21 : f32 to vector<1x256xf32>
      %48 = arith.select %37, %46, %47 : vector<1x256xi1>, vector<1x256xf32>
      %49 = arith.subf %45, %48 : vector<1x256xf32>
      %cst_22 = arith.constant 2.000000e+00 : f32
      %50 = vector.broadcast %cst_22 : f32 to vector<1x256xf32>
      %51 = arith.mulf %50, %42 : vector<1x256xf32>
      %52 = arith.addf %45, %51 : vector<1x256xf32>
      %53 = arith.addf %52, %48 : vector<1x256xf32>
      %c16_i32_23 = arith.constant 16 : i32
      %54 = tpu.dynamic_rotate %49 by %c16_i32_23 dim 1 : vector<1x256xf32>, i32 -> vector<1x256xf32>
      %cst_24 = arith.constant 0.000000e+00 : f32
      %55 = vector.broadcast %cst_24 : f32 to vector<1x256xf32>
      %56 = arith.select %39, %54, %55 : vector<1x256xi1>, vector<1x256xf32>
      %cst_25 = arith.constant 2.000000e+00 : f32
      %57 = vector.broadcast %cst_25 : f32 to vector<1x256xf32>
      %58 = arith.mulf %57, %49 : vector<1x256xf32>
      %59 = arith.addf %56, %58 : vector<1x256xf32>
      %c240_i32_26 = arith.constant 240 : i32
      %60 = tpu.dynamic_rotate %49 by %c240_i32_26 dim 1 : vector<1x256xf32>, i32 -> vector<1x256xf32>
      %cst_27 = arith.constant 0.000000e+00 : f32
      %61 = vector.broadcast %cst_27 : f32 to vector<1x256xf32>
      %62 = arith.select %41, %60, %61 : vector<1x256xi1>, vector<1x256xf32>
      %63 = arith.addf %59, %62 : vector<1x256xf32>
      %c16_i32_28 = arith.constant 16 : i32
      %64 = tpu.dynamic_rotate %53 by %c16_i32_28 dim 1 : vector<1x256xf32>, i32 -> vector<1x256xf32>
      %cst_29 = arith.constant 0.000000e+00 : f32
      %65 = vector.broadcast %cst_29 : f32 to vector<1x256xf32>
      %66 = arith.select %39, %64, %65 : vector<1x256xi1>, vector<1x256xf32>
      %c240_i32_30 = arith.constant 240 : i32
      %67 = tpu.dynamic_rotate %53 by %c240_i32_30 dim 1 : vector<1x256xf32>, i32 -> vector<1x256xf32>
      %cst_31 = arith.constant 0.000000e+00 : f32
      %68 = vector.broadcast %cst_31 : f32 to vector<1x256xf32>
      %69 = arith.select %41, %67, %68 : vector<1x256xi1>, vector<1x256xf32>
      %70 = arith.subf %66, %69 : vector<1x256xf32>
      %71 = arith.mulf %63, %63 : vector<1x256xf32>
      %72 = arith.mulf %70, %70 : vector<1x256xf32>
      %73 = arith.addf %71, %72 : vector<1x256xf32>
      %c0_32 = arith.constant 0 : index
      %c0_33 = arith.constant 0 : index
      %74 = vector.load %arg7[%c0_32, %c0_33] : memref<1x256xf32, #tpu.memory_space<vmem>>, vector<1x256xf32>
      %c1_i32_34 = arith.constant 1 : i32
      %75 = tpu.dynamic_rotate %74 by %c1_i32_34 dim 1 : vector<1x256xf32>, i32 -> vector<1x256xf32>
      %cst_35 = arith.constant 0.000000e+00 : f32
      %76 = vector.broadcast %cst_35 : f32 to vector<1x256xf32>
      %77 = arith.select %35, %75, %76 : vector<1x256xi1>, vector<1x256xf32>
      %c255_i32_36 = arith.constant 255 : i32
      %78 = tpu.dynamic_rotate %74 by %c255_i32_36 dim 1 : vector<1x256xf32>, i32 -> vector<1x256xf32>
      %cst_37 = arith.constant 0.000000e+00 : f32
      %79 = vector.broadcast %cst_37 : f32 to vector<1x256xf32>
      %80 = arith.select %37, %78, %79 : vector<1x256xi1>, vector<1x256xf32>
      %81 = arith.subf %77, %80 : vector<1x256xf32>
      %cst_38 = arith.constant 2.000000e+00 : f32
      %82 = vector.broadcast %cst_38 : f32 to vector<1x256xf32>
      %83 = arith.mulf %82, %74 : vector<1x256xf32>
      %84 = arith.addf %77, %83 : vector<1x256xf32>
      %85 = arith.addf %84, %80 : vector<1x256xf32>
      %c16_i32_39 = arith.constant 16 : i32
      %86 = tpu.dynamic_rotate %81 by %c16_i32_39 dim 1 : vector<1x256xf32>, i32 -> vector<1x256xf32>
      %cst_40 = arith.constant 0.000000e+00 : f32
      %87 = vector.broadcast %cst_40 : f32 to vector<1x256xf32>
      %88 = arith.select %39, %86, %87 : vector<1x256xi1>, vector<1x256xf32>
      %cst_41 = arith.constant 2.000000e+00 : f32
      %89 = vector.broadcast %cst_41 : f32 to vector<1x256xf32>
      %90 = arith.mulf %89, %81 : vector<1x256xf32>
      %91 = arith.addf %88, %90 : vector<1x256xf32>
      %c240_i32_42 = arith.constant 240 : i32
      %92 = tpu.dynamic_rotate %81 by %c240_i32_42 dim 1 : vector<1x256xf32>, i32 -> vector<1x256xf32>
      %cst_43 = arith.constant 0.000000e+00 : f32
      %93 = vector.broadcast %cst_43 : f32 to vector<1x256xf32>
      %94 = arith.select %41, %92, %93 : vector<1x256xi1>, vector<1x256xf32>
      %95 = arith.addf %91, %94 : vector<1x256xf32>
      %c16_i32_44 = arith.constant 16 : i32
      %96 = tpu.dynamic_rotate %85 by %c16_i32_44 dim 1 : vector<1x256xf32>, i32 -> vector<1x256xf32>
      %cst_45 = arith.constant 0.000000e+00 : f32
      %97 = vector.broadcast %cst_45 : f32 to vector<1x256xf32>
      %98 = arith.select %39, %96, %97 : vector<1x256xi1>, vector<1x256xf32>
      %c240_i32_46 = arith.constant 240 : i32
      %99 = tpu.dynamic_rotate %85 by %c240_i32_46 dim 1 : vector<1x256xf32>, i32 -> vector<1x256xf32>
      %cst_47 = arith.constant 0.000000e+00 : f32
      %100 = vector.broadcast %cst_47 : f32 to vector<1x256xf32>
      %101 = arith.select %41, %99, %100 : vector<1x256xi1>, vector<1x256xf32>
      %102 = arith.subf %98, %101 : vector<1x256xf32>
      %103 = arith.mulf %95, %95 : vector<1x256xf32>
      %104 = arith.mulf %102, %102 : vector<1x256xf32>
      %105 = arith.addf %103, %104 : vector<1x256xf32>
      %cst_48 = arith.constant 1.000000e+00 : f32
      %106 = vector.broadcast %cst_48 : f32 to vector<1x256xf32>
      %107 = arith.cmpf olt, %73, %106 : vector<1x256xf32>
      %108 = arith.extui %107 : vector<1x256xi1> to vector<1x256xi32>
      %109 = arith.sitofp %108 : vector<1x256xi32> to vector<1x256xf32>
      %110 = arith.subf %73, %105 : vector<1x256xf32>
      %c0_49 = arith.constant 0 : index
      %c0_50 = arith.constant 0 : index
      %c0_51 = arith.constant 0 : index
      %111 = vector.load %arg4[%c0_49, %c0_50, %c0_51] : memref<1x1x1xf32, #tpu.memory_space<vmem>>, vector<1x1x1xf32>
      %112 = arith.mulf %109, %110 : vector<1x256xf32>
      %113 = arith.mulf %112, %110 : vector<1x256xf32>
      %114 = vector.shape_cast %113 : vector<1x256xf32> to vector<1x1x256xf32>
      %cst_52 = arith.constant dense<0.000000e+00> : vector<1xf32>
      %115 = vector.multi_reduction <add>, %114, %cst_52 [1, 2] : vector<1x1x256xf32> to vector<1xf32>
      %116 = vector.shape_cast %115 : vector<1xf32> to vector<1x1x1xf32>
      %117 = vector.extract %116[0, 0, 0] : f32 from vector<1x1x1xf32>
      %118 = vector.broadcast %117 : f32 to vector<1x1x1xf32>
      %119 = arith.addf %111, %118 : vector<1x1x1xf32>
      %c0_53 = arith.constant 0 : index
      %c0_54 = arith.constant 0 : index
      %c0_55 = arith.constant 0 : index
      %120 = vector.load %arg4[%c0_53, %c0_54, %c0_55] : memref<1x1x1xf32, #tpu.memory_space<vmem>>, vector<1x1x1xf32>
      tpu.vector_store %arg4[%c0_53, %c0_54, %c0_55], %119 {strides = array<i32>} : memref<1x1x1xf32, #tpu.memory_space<vmem>>, vector<1x1x1xf32>,
      %c0_56 = arith.constant 0 : index
      %c0_57 = arith.constant 0 : index
      %c0_58 = arith.constant 0 : index
      %121 = vector.load %arg5[%c0_56, %c0_57, %c0_58] : memref<1x1x1xi32, #tpu.memory_space<vmem>>, vector<1x1x1xi32>
      %122 = arith.extui %107 : vector<1x256xi1> to vector<1x256xi32>
      %123 = vector.shape_cast %122 : vector<1x256xi32> to vector<1x1x256xi32>
      %cst_59 = arith.constant dense<0> : vector<1xi32>
      %124 = vector.multi_reduction <add>, %123, %cst_59 [1, 2] : vector<1x1x256xi32> to vector<1xi32>
      %125 = vector.shape_cast %124 : vector<1xi32> to vector<1x1x1xi32>
      %126 = vector.extract %125[0, 0, 0] : i32 from vector<1x1x1xi32>
      %127 = vector.broadcast %126 : i32 to vector<1x1x1xi32>
      %128 = arith.addi %121, %127 : vector<1x1x1xi32>
      %c0_60 = arith.constant 0 : index
      %c0_61 = arith.constant 0 : index
      %c0_62 = arith.constant 0 : index
      %129 = vector.load %arg5[%c0_60, %c0_61, %c0_62] : memref<1x1x1xi32, #tpu.memory_space<vmem>>, vector<1x1x1xi32>
      tpu.vector_store %arg5[%c0_60, %c0_61, %c0_62], %128 {strides = array<i32>} : memref<1x1x1xi32, #tpu.memory_space<vmem>>, vector<1x1x1xi32>,
    } else {
    }
    return
  }
  func.func @transform_0(%arg0: i32, %arg1: i32) -> (i32, i32, i32) {
    %c0_i32 = arith.constant 0 : i32
    %c0_i32_0 = arith.constant 0 : i32
    return %arg0, %arg1, %c0_i32 : i32, i32, i32
  }
  func.func @transform_1(%arg0: i32, %arg1: i32) -> (i32, i32, i32) {
    %c0_i32 = arith.constant 0 : i32
    %c0_i32_0 = arith.constant 0 : i32
    return %arg0, %arg1, %c0_i32 : i32, i32, i32
  }
  func.func @transform_2(%arg0: i32, %arg1: i32) -> (i32, i32, i32) {
    %c0_i32 = arith.constant 0 : i32
    %c0_i32_0 = arith.constant 0 : i32
    %c0_i32_1 = arith.constant 0 : i32
    return %arg0, %c0_i32, %c0_i32_0 : i32, i32, i32
  }
  func.func @transform_3(%arg0: i32, %arg1: i32) -> (i32, i32, i32) {
    %c0_i32 = arith.constant 0 : i32
    %c0_i32_0 = arith.constant 0 : i32
    %c0_i32_1 = arith.constant 0 : i32
    return %arg0, %c0_i32, %c0_i32_0 : i32, i32, i32
  }
}

</mosaic_0001>

<bundles_post_ra>
// kernel: tpu_custom_call.1
= control target key start
LH: loop header
LB: loop body
LE: loop exit
PB: predicated region body
PF: predicated region fallthrough
CT: control target
= control target key end

     0   :  { %9 = vsyncpa [#allocation5], 0  ;;  %s1373_s0 = inlined_call_operand.hbm [shape: f32[2,4,256], index: 0, kind: input, shape index: {}]   ;;  %s1374_s1 = inlined_call_operand.hbm [shape: f32[2,4,256], index: 1, kind: input, shape index: {}]   ;;  %s1375_s2 = inlined_call_operand.vmem [shape: f32[2,1,1], index: 2, kind: output, shape index: {0}]   ;;  %s1376_s3 = inlined_call_operand.vmem [shape: s32[2,1,1], index: 3, kind: output, shape index: {1}]  }
   0x1   :  { %11 = vsyncpa [#allocation5 + $0x1], 0 }
   0x2   :  { %12 = vsyncpa [#allocation7], 0 }
   0x3   :  { %14 = vsyncpa [#allocation7 + $0x1], 0  ;;  %s1028_s12 = smov 0   ;;  %s1030_s13 = smov 0  }
   0x4   :  { %s1032_s14 = smov 0   ;;  %s1034_s15 = smov 0  }
   0x5   :  { %s1036_s16 = smov 0   ;;  %s1038_s17 = smov 0  }
   0x6 LB: > { %s791_s18 = sadd.s32 4294967295, %s997_s17   ;;  %s32_s19 = sadd.s32 1, %s993_s16  ;;  %s997_s17 = sphi %s1038_s17, %s20_s17   ;;  %s993_s16 = sphi %s1036_s16, %s1398_s16   ;;  %s989_s15 = sphi %s1034_s15, %s1397_s15   ;;  %s985_s14 = sphi %s1032_s14, %s1396_s14   ;;  %s981_s13 = sphi %s1030_s13, %s1395_s13   ;;  %s977_s12 = sphi %s1028_s12, %s1394_s12  }
   0x7   : > { %p34_p0 = scmp.ge.s32.totalorder %s32_s19, 2  ;;  %s41_s20 = sadd.s32 1, %s985_s14 }
   0x8   : > { %p48_p1 = scmp.ne.s32.totalorder %s985_s14, %s981_s13  ;;  %p49_p2 = scmp.eq.s32.totalorder %s997_s17, 0 }
   0x9   : > { %s1400_s19 = smov (%p34_p0, %s32_s19), 0  ;;  %p54_p4 = scmp.ne.s32.totalorder %s981_s13, %s977_s12 }
   0xa   : > { %p1064_p3 = por %p49_p2, %p48_p1  ;;  %s36_s22 = ssub.s32 %s993_s16, %s1400_s19 }
   0xb   : > { %p55_p5 = scmp.eq.s32.totalorder %s791_s18, 0  ;;  %p39_p6 = scmp.eq.s32.totalorder %s36_s22, 0 }
   0xc   : > { %p825_p8 = scmp.lt.s32.totalorder %s997_s17, 2  ;;  %s1080_s25 = sand.u32 1, %s985_s14  }
   0xd   : > { %p1071_p7 = por %p55_p5, %p54_p4  ;;  %s808_s26 = sshll.u32 %s993_s16, 7 }
   0xe   : > { %s1077_s24 = scalar_select %p39_p6, %s985_s14, %s41_s20  }
   0xf   : > { %s1379_s23 = scalar_select %p1071_p7, 1, 0 }
  0x10   : > { %s795_s27 = sshll.u32 %s1080_s25, 3  ;;  %s1089_s30 = scalar_lea.hbm %s1373_s0, %s808_s26 }
  0x11   : > { %s162_s4 = scalar_lea.vmem [#allocation4], %s795_s27  ;;  %p1095_p9 = pnand %p825_p8, %p1064_p3 }
  0x12   : > { %s172_s5 = sshll.u32 %s162_s4, 4  ;;  %s159_s7 = scalar_lea.sflag [#allocation5], %s1080_s25  ;;  %s1099_s5 = int_to_ptr.vmem [resolvable:$true] %s172_s5 }
  0x13   : > { %s883_s8 = scalar_lea.hbm %s1089_s30, 128  ;;  %p885_p13 = pneg %p1095_p9 }
  0x14   : > { %p884_p12 = scmp.ne.s32.totalorder %s1089_s30, %s883_s8  ;;  %s888_s11 = scalar_lea.hbm %s1373_s0, 256 }
  0x15   : > { %p889_p2 = scmp.lt.u32.totalorder %s1089_s30, %s1373_s0  ;;  %p890_p3 = scmp.lt.u32.totalorder %s888_s11, %s883_s8 }
  0x16   : > { %p886_p0 = pnand %p885_p13, %p884_p12  ;;  %p892_p5 = scmp.lt.u32.totalorder %s883_s8, %s1089_s30 }
  0x17   : > { %p891_p4 = por %p890_p3, %p889_p2 }
  0x18   : > { %p887_p1 = pneg %p886_p0 }
  0x19   : > { %p893_p6 = por %p892_p5, %p891_p4 }
  0x1b   : > { %p894_p8 = pnand %p893_p6, %p887_p1 }
  0x1d   : > { %897 = shalt.err (!%p894_p8)
}
  0x1e   : > { %s898_s20 = scalar_lea.vmem %s1099_s5, 128  ;;  %s999_s21 = smov [#allocation4]  }
  0x1f   : > { %p899_p12 = scmp.ne.s32.totalorder %s1099_s5, %s898_s20  ;;  %s903_s22 = sshll.u32 %s999_s21, 4  ;;  %s904_s22 = int_to_ptr.vmem [resolvable:$false] %s903_s22 }
  0x20   : > { %s905_s28 = scalar_lea.vmem %s904_s22, 256  ;;  %p906_p11 = scmp.lt.s32.totalorder %s1099_s5, %s904_s22 }
  0x21   : > { %p901_p0 = pnand %p899_p12, %p885_p13  ;;  %p907_p2 = scmp.lt.s32.totalorder %s905_s28, %s898_s20 }
  0x23   : > { %p902_p10 = pneg %p901_p0  ;;  %p908_p3 = por %p907_p2, %p906_p11 }
  0x25   : > { %p909_p4 = pnand %p908_p3, %p902_p10 }
  0x27   : > { %912 = shalt.err (!%p909_p4)
}
  0x28   : > { %821 = dma.hbm_to_vmem [thread:$0]  (!%p1095_p9), %s1089_s30, 128, %s1099_s5, %s159_s7  }
  0x29   : > { %p1381_p1 = scmp.lt.s32.totalorder %s997_s17, 3  ;;  %p1382_p5 = scmp.ge.s32.totalorder %s997_s17, 1 }
  0x2a   : > { %s1142_s9 = scalar_lea.hbm %s1374_s1, %s808_s26  ;;  %s183_s10 = scalar_lea.vmem [#allocation6], %s795_s27 }
  0x2b   : > { %p1133_p6 = pnand %p1382_p5, %p1381_p1  ;;  %s193_s11 = sshll.u32 %s183_s10, 4  ;;  %s194_s11 = int_to_ptr.vmem [resolvable:$true] %s193_s11 }
  0x2c   : > { %s180_s30 = scalar_lea.sflag [#allocation7], %s1080_s25  ;;  %s913_s5 = scalar_lea.hbm %s1142_s9, 128 }
  0x2d   : > { %s1383_s29 = scalar_select %p1133_p6, 1, 0 }
  0x2e   : > { %p914_p10 = scmp.ne.s32.totalorder %s1142_s9, %s913_s5  ;;  %s918_s26 = scalar_lea.hbm %s1374_s1, 256 }
  0x2f   : > { %p919_p12 = scmp.lt.u32.totalorder %s1142_s9, %s1374_s1  ;;  %p920_p0 = scmp.lt.u32.totalorder %s918_s26, %s913_s5 }
  0x30   : > { %p916_p11 = pnand %p914_p10, %p885_p13  ;;  %p922_p3 = scmp.lt.u32.totalorder %s913_s5, %s1142_s9 }
  0x31   : > { %p921_p2 = por %p920_p0, %p919_p12 }
  0x32   : > { %p917_p8 = pneg %p916_p11 }
  0x33   : > { %p923_p4 = por %p922_p3, %p921_p2 }
  0x35   : > { %p924_p1 = pnand %p923_p4, %p917_p8 }
  0x37   : > { %927 = shalt.err (!%p924_p1)
}
  0x38   : > { %s928_s25 = scalar_lea.vmem %s194_s11, 128  ;;  %s1000_s27 = smov [#allocation6]  }
  0x39   : > { %p929_p5 = scmp.ne.s32.totalorder %s194_s11, %s928_s25  ;;  %s933_s21 = sshll.u32 %s1000_s27, 4  ;;  %s934_s21 = int_to_ptr.vmem [resolvable:$false] %s933_s21 }
  0x3a   : > { %s935_s22 = scalar_lea.vmem %s934_s21, 256  ;;  %p936_p7 = scmp.lt.s32.totalorder %s194_s11, %s934_s21 }
  0x3b   : > { %p931_p10 = pnand %p929_p5, %p885_p13  ;;  %p937_p6 = scmp.lt.s32.totalorder %s935_s22, %s928_s25 }
  0x3d   : > { %p932_p11 = pneg %p931_p10  ;;  %p938_p0 = por %p937_p6, %p936_p7 }
  0x3f   : > { %p939_p12 = pnand %p938_p0, %p932_p11 }
  0x41   : > { %942 = shalt.err (!%p939_p12)
}
  0x42   : > { %824 = dma.hbm_to_vmem [thread:$0]  (!%p1095_p9), %s1142_s9, 128, %s194_s11, %s180_s30  }
  0x43   : > { %p1384_p8 = scmp.ne.s32.totalorder %s1383_s29, 0 }
  0x44   : > { %s204_s28 = sand.u32 (!%p1384_p8), 1, %s981_s13   ;;  %p1385_p13 = scmp.ne.s32.totalorder (!%p1384_p8), %s1379_s23, 0 }
  0x45   : > { %202 = sbr.rel (%p1384_p8) target bundleno = 603 (0x25b), region = 28  ;;  %s802_s4 = sshll.u32 (!%p1384_p8), %s204_s28, 3 }
  0x46   : > { %s205_s8 = scalar_lea.sflag (!%p1384_p8), [#allocation5], %s204_s28  ;;  %s208_s10 = scalar_lea.vmem (!%p1384_p8), [#allocation4], %s802_s4 }
  0x4c   : > { %968 = dma.done.wait (%p1385_p13), %s205_s8, 128  }
  0x4d   : > { %970 = vsyncadd (%p1385_p13), %s205_s8, 4294967168  ;;  %s214_s5 = scalar_lea.sflag [#allocation7], %s204_s28  ;;  %s217_s7 = scalar_lea.vmem [#allocation6], %s802_s4 }
  0x4e   : > { %972 = dma.done.wait (%p1385_p13), %s214_s5, 128  }
  0x4f   : > { %974 = vsyncadd (%p1385_p13), %s214_s5, 4294967168  ;;  %vm256_vm0 = vcmask 1043456   ;;  %v252_v0 = vld [vmem:[%s208_s10] sm:$0xff]  ;;  %v271_v1 = vld [vmem:[%s217_s7] sm:$0xff]  ;;  %v1001_v14 = vmov 1966171168   ;;  %v299_v16 = vlaneseq }
  0x50   : > { %v254_v2 = vcombine.high %v252_v0, %v252_v0  ;;  %v257_v3 = vsel %vm256_vm0, %v252_v0, 0.0  ;;  %v273_v4 = vcombine.high %v271_v1, %v271_v1  ;;  %v275_v5 = vsel %vm256_vm0, %v271_v1, 0.0  ;;  %s1002_s23 = smov 127   ;;  %s1003_s6 = smov 1  }
  0x51   : > { %v258_v6 = vrot.slane %v257_v3, 4  ;;  %v276_v7 = vrot.slane %v275_v5, 4  ;;  %v297_v15 = vunpack.c.l.s4 %v1001_v14  ;;  %v300_v26 = vshrl.u32 %v299_v16, 7  ;;  %s1004_s29 = smov 16   ;;  %s1005_s9 = smov 112  }
  0x52   : > { %v264_v8 = vsel %vm256_vm0, %v254_v2, 0.0  ;;  %v282_v9 = vsel %vm256_vm0, %v273_v4, 0.0  ;;  %vm313_vm1 = vcmp.lt.s32.totalorder %v299_v16, 256  ;;  %v1197_v58 = vand.u32 127, %v299_v16  ;;  %p246_p7 = scmp.lt.s32.totalorder %s989_s15, 1 }
  0x53   : > { %v259_v10 = vadd.f32 %v258_v6, %v257_v3  ;;  %v265_v11 = vrot.slane %v264_v8, 4  ;;  %v277_v12 = vadd.f32 %v276_v7, %v275_v5  ;;  %v283_v13 = vrot.slane %v282_v9, 4 }
  0x54   : > { %v298_v25 = vunpack.c.0.s8 %v297_v15  ;;  %v1177_v44 = vsub.s32 0, %v300_v26  ;;  %v1179_v45 = vsub.s32 1, %v300_v26  ;;  %v1200_v59 = vadd.s32 128, %v1197_v58  ;;  %s1402_s15 = smov (!%p246_p7, %s989_s15), 1 }
  0x55   : > { %v260_v17 = vrot.slane %v259_v10, 2  ;;  %v266_v18 = vadd.f32 %v265_v11, %v264_v8  ;;  %v278_v19 = vrot.slane %v277_v12, 2  ;;  %v284_v20 = vadd.f32 %v283_v13, %v282_v9  ;;  %s1338_s12 = scalar_lea.vmem %s1375_s2, %s1402_s15  ;;  %s1345_s20 = scalar_lea.vmem %s1376_s3, %s1402_s15 }
  0x56   : > { %v301_v37 = vsub.s32 %v298_v25, %v300_v26  ;;  %v398_v60 = vand.u32 15, %v1197_v58  ;;  %v405_v61 = vand.u32 15, %v1200_v59  ;;  %vm451_vm2 = vcmp.lt.s32.totalorder %v1197_v58, 127 }
  0x57   : > { %v261_v21 = vadd.f32 %v260_v17, %v259_v10  ;;  %v267_v22 = vrot.slane %v266_v18, 2  ;;  %v279_v23 = vadd.f32 %v278_v19, %v277_v12  ;;  %v285_v24 = vrot.slane %v284_v20, 2 }
  0x58   : > { %vm442_vm3 = vcmp.lt.s32.totalorder %v1197_v58, 1  ;;  %vm1206_vm4 = vcmp.ne.s32.totalorder %v398_v60, 15  ;;  %vm1210_vm5 = vcmp.ne.s32.totalorder %v405_v61, 15  ;;  %vm1214_vm6 = vcmp.ne.s32.totalorder %v398_v60, 0 }
  0x59   : > { %v262_v27 = vrot.slane %v261_v21, 1  ;;  %v268_v28 = vadd.f32 %v267_v22, %v266_v18  ;;  %v280_v29 = vrot.slane %v279_v23, 1  ;;  %v286_v30 = vadd.f32 %v285_v24, %v284_v20 }
  0x5a   : > { %vm1218_vm7 = vcmp.ne.s32.totalorder %v405_v61, 0  ;;  %vm478_vm8 = vcmp.lt.s32.totalorder %v1197_v58, 16  ;;  %vm422_vm9 = vcmp.ge.s32.totalorder %v1197_v58, 16  ;;  %vm491_vm10 = vcmp.lt.s32.totalorder %v1197_v58, 112 }
  0x5b   : > { %v263_v31 = vadd.f32 %v262_v27, %v261_v21  ;;  %v269_v32 = vrot.slane %v268_v28, 1  ;;  %v281_v33 = vadd.f32 %v280_v29, %v279_v23  ;;  %v287_v34 = vrot.slane %v286_v30, 1 }
  0x5c   : > { %vm425_vm11 = vcmp.lt.s32.totalorder %v1200_v59, 240  ;;  %vm627_vm12 = vcmask 1040384   ;;  %vm335_vm15 = vcmask 0  }
  0x5d   : > { %v270_v35 = vadd.f32 %v269_v32, %v268_v28  ;;  %v288_v36 = vadd.f32 %v287_v34, %v286_v30 }
  0x5f   : > { %v295_v38 = vcombine.low %v263_v31, %v270_v35  ;;  %v318_v39 = vcombine.low %v281_v33, %v288_v36 }
  0x61   : > { %v302_v40 = vrot.slane %v295_v38, %v301_v37  ;;  %v325_v41 = vrot.slane %v318_v39, %v301_v37 }
  0x63   : > { %v309_v42 = vrot.slane %v302_v40, %v301_v37  ;;  %v332_v43 = vrot.slane %v325_v41, %v301_v37 }
  0x65   : > { %315 = vst.msk [vmem:[#allocation2] sm:$0x3] %vm313_vm1, %v309_v42  ;;  %334 = vst.msk [vmem:[#allocation3] sm:$0x3] %vm313_vm1, %v332_v43 }
  0x6c   : > { %v426_v46 = vld [vmem:[#allocation2] sm:$0x3]  ;;  %v522_v49 = vld [vmem:[#allocation3] sm:$0x3] }
  0x6d   : > { %v431_v47 = vrot.slane %v426_v46, %v1177_v44  ;;  %v1182_v48 = vmul.f32 2.0, %v426_v46  ;;  %v1184_v50 = vmul.f32 2.0, %v522_v49  ;;  %v435_v51 = vrot.slane %v426_v46, %v1179_v45 }
  0x6e   : > { %v531_v56 = vrot.slane %v522_v49, %v1179_v45  ;;  %v527_v57 = vrot.slane %v522_v49, %v1177_v44 }
  0x6f   : > { %447 = vrot.lane.b32.xlu1 %v431_v47, %s1002_s23  ;;  %438 = vrot.lane.b32.xlu0 %v431_v47, %s1003_s6  ;;  %v463_v52 = vrot.slane %v1182_v48, %v1177_v44  ;;  %v467_v53 = vrot.slane %v1182_v48, %v1179_v45  ;;  %v557_v54 = vrot.slane %v1184_v50, %v1177_v44 }
  0x70   : > { %v561_v55 = vrot.slane %v1184_v50, %v1179_v45 }
  0x73   : > { %449 = vrot.lane.b32.xlu1 %v435_v51, %s1002_s23  ;;  %440 = vrot.lane.b32.xlu0 %v435_v51, %s1003_s6 }
  0x77   : > { %536 = vrot.lane.b32.xlu1 %v531_v56, %s1003_s6  ;;  %534 = vrot.lane.b32.xlu0 %v527_v57, %s1003_s6 }
  0x7b   : > { %544 = vrot.lane.b32.xlu1 %v531_v56, %s1002_s23  ;;  %542 = vrot.lane.b32.xlu0 %v527_v57, %s1002_s23 }
  0xe1   : > { %v448_v62 = vpop.permute.xlu1 %447  ;;  %v439_v63 = vpop.permute.xlu0 %438 }
  0xe5   : > { %v450_v4 = vpop.permute.xlu1 %449  ;;  %v441_v5 = vpop.permute.xlu0 %440 }
  0xe6   : > { %v452_v6 = vsel %vm451_vm2, %v448_v62, %v450_v4  ;;  %v453_v7 = vsel %vm451_vm2, %v450_v4, %v448_v62  ;;  %v443_v8 = vsel %vm442_vm3, %v439_v63, %v441_v5  ;;  %v444_v9 = vsel %vm442_vm3, %v441_v5, %v439_v63 }
  0xe7   : > { %v454_v10 = vsel %vm1206_vm4, %v452_v6, 0.0  ;;  %v455_v11 = vsel %vm1210_vm5, %v453_v7, 0.0  ;;  %v445_v12 = vsel %vm1214_vm6, %v444_v9, 0.0  ;;  %v446_v13 = vsel %vm1218_vm7, %v443_v8, 0.0 }
  0xe8   : > { %v456_v14 = vsub.f32 %v445_v12, %v454_v10  ;;  %v457_v15 = vsub.f32 %v446_v13, %v455_v11  ;;  %v470_v30 = vadd.f32 %v463_v52, %v445_v12  ;;  %v471_v31 = vadd.f32 %v467_v53, %v446_v13 }
  0xe9   : > { %v537_v16 = vpop.permute.xlu1 %536  ;;  %v535_v17 = vpop.permute.xlu0 %534 }
  0xea   : > { %474 = vrot.lane.b32.xlu0 %v456_v14, %s1004_s29  ;;  %476 = vrot.lane.b32.xlu1 %v457_v15, %s1004_s29  ;;  %v538_v18 = vsel %vm442_vm3, %v535_v17, %v537_v16  ;;  %v539_v19 = vsel %vm442_vm3, %v537_v16, %v535_v17  ;;  %v473_v32 = vadd.f32 %v471_v31, %v455_v11  ;;  %v483_v48 = vmul.f32 2.0, %v456_v14 }
  0xeb   : > { %v540_v24 = vsel %vm1214_vm6, %v539_v19, 0.0  ;;  %v541_v25 = vsel %vm1218_vm7, %v538_v18, 0.0  ;;  %v472_v33 = vadd.f32 %v470_v30, %v454_v10 }
  0xec   : > { %v564_v34 = vadd.f32 %v557_v54, %v540_v24  ;;  %v565_v35 = vadd.f32 %v561_v55, %v541_v25  ;;  %v484_v54 = vmul.f32 2.0, %v457_v15 }
  0xed   : > { %v545_v20 = vpop.permute.xlu1 %544  ;;  %v543_v21 = vpop.permute.xlu0 %542 }
  0xee   : > { %v546_v22 = vsel %vm451_vm2, %v543_v21, %v545_v20  ;;  %v547_v23 = vsel %vm451_vm2, %v545_v20, %v543_v21  ;;  %487 = vrot.lane.b32.xlu0 %v456_v14, %s1005_s9  ;;  %489 = vrot.lane.b32.xlu1 %v457_v15, %s1005_s9 }
  0xef   : > { %v548_v26 = vsel %vm1206_vm4, %v546_v22, 0.0  ;;  %v549_v27 = vsel %vm1210_vm5, %v547_v23, 0.0 }
  0xf0   : > { %v550_v28 = vsub.f32 %v540_v24, %v548_v26  ;;  %v1256_v29 = vsub.f32 %v541_v25, %v549_v27  ;;  %v566_v36 = vadd.f32 %v564_v34, %v548_v26  ;;  %v567_v37 = vadd.f32 %v565_v35, %v549_v27 }
  0xf1   : > { %v1006_v35 = vmov 0  }
  0xf2   : > { %570 = vrot.lane.b32.xlu1 %v1256_v29, %s1004_s29  ;;  %568 = vrot.lane.b32.xlu0 %v550_v28, %s1004_s29  ;;  %v576_v63 = vmul.f32 2.0, %v550_v28  ;;  %v577_v15 = vmul.f32 2.0, %v1256_v29  ;;  %337 = vst.msk [vmem:[%s1345_s20] sm:$0x1] %vm335_vm15, %v1006_v35 }
  0xf6   : > { %582 = vrot.lane.b32.xlu1 %v1256_v29, %s1005_s9  ;;  %580 = vrot.lane.b32.xlu0 %v550_v28, %s1005_s9 }
  0xfa   : > { %500 = vrot.lane.b32.xlu1 %v473_v32, %s1004_s29  ;;  %498 = vrot.lane.b32.xlu0 %v472_v33, %s1004_s29 }
  0xfe   : > { %508 = vrot.lane.b32.xlu1 %v473_v32, %s1005_s9  ;;  %506 = vrot.lane.b32.xlu0 %v472_v33, %s1005_s9 }
 0x102   : > { %592 = vrot.lane.b32.xlu1 %v567_v37, %s1004_s29  ;;  %590 = vrot.lane.b32.xlu0 %v566_v36, %s1004_s29 }
 0x106   : > { %600 = vrot.lane.b32.xlu1 %v567_v37, %s1005_s9  ;;  %598 = vrot.lane.b32.xlu0 %v566_v36, %s1005_s9 }
 0x15c   : > { %v477_v38 = vpop.permute.xlu1 %476  ;;  %v475_v39 = vpop.permute.xlu0 %474 }
 0x15d   : > { %v480_v44 = vsel %vm478_vm8, %v477_v38, %v475_v39  ;;  %v479_v50 = vsel %vm478_vm8, %v475_v39, %v477_v38 }
 0x15e   : > { %v481_v47 = vsel %vm422_vm9, %v480_v44, 0.0  ;;  %v486_v61 = vadd.f32 %v484_v54, %v479_v50 }
 0x15f   : > { %v485_v51 = vadd.f32 %v483_v48, %v481_v47 }
 0x160   : > { %v490_v40 = vpop.permute.xlu1 %489  ;;  %v488_v41 = vpop.permute.xlu0 %487 }
 0x161   : > { %v493_v49 = vsel %vm491_vm10, %v490_v40, %v488_v41  ;;  %v492_v55 = vsel %vm491_vm10, %v488_v41, %v490_v40 }
 0x162   : > { %v495_v57 = vsel %vm425_vm11, %v493_v49, 0.0  ;;  %v496_v62 = vadd.f32 %v492_v55, %v485_v51 }
 0x163   : > { %v497_v3 = vadd.f32 %v495_v57, %v486_v61 }
 0x164   : > { %v571_v42 = vpop.permute.xlu1 %570  ;;  %v569_v43 = vpop.permute.xlu0 %568  ;;  %v516_v14 = vmul.f32 %v496_v62, %v496_v62 }
 0x165   : > { %v573_v56 = vsel %vm478_vm8, %v571_v42, %v569_v43  ;;  %v572_v11 = vsel %vm478_vm8, %v569_v43, %v571_v42  ;;  %v517_v20 = vmul.f32 %v497_v3, %v497_v3 }
 0x166   : > { %v574_v0 = vsel %vm422_vm9, %v573_v56, 0.0  ;;  %v579_v24 = vadd.f32 %v577_v15, %v572_v11 }
 0x167   : > { %v578_v12 = vadd.f32 %v576_v63, %v574_v0 }
 0x168   : > { %v583_v45 = vpop.permute.xlu1 %582  ;;  %v581_v46 = vpop.permute.xlu0 %580 }
 0x169   : > { %v585_v7 = vsel %vm491_vm10, %v583_v45, %v581_v46  ;;  %v584_v16 = vsel %vm491_vm10, %v581_v46, %v583_v45 }
 0x16a   : > { %v587_v21 = vsel %vm425_vm11, %v585_v7, 0.0  ;;  %v588_v26 = vadd.f32 %v584_v16, %v578_v12 }
 0x16b   : > { %v589_v28 = vadd.f32 %v587_v21, %v579_v24 }
 0x16c   : > { %v501_v52 = vpop.permute.xlu1 %500  ;;  %v499_v53 = vpop.permute.xlu0 %498  ;;  %v608_v43 = vmul.f32 %v588_v26, %v588_v26 }
 0x16d   : > { %v503_v60 = vsel %vm478_vm8, %v501_v52, %v499_v53  ;;  %v502_v8 = vsel %vm478_vm8, %v499_v53, %v501_v52  ;;  %v609_v58 = vmul.f32 %v589_v28, %v589_v28  ;;  %v1007_v53 = vmov 0.0  }
 0x16e   : > { %v504_v4 = vsel %vm422_vm9, %v503_v60, 0.0  ;;  %336 = vst.msk [vmem:[%s1338_s12] sm:$0x1] %vm335_vm15, %v1007_v53 }
 0x170   : > { %v509_v1 = vpop.permute.xlu1 %508  ;;  %v507_v2 = vpop.permute.xlu0 %506 }
 0x171   : > { %v510_v5 = vsel %vm491_vm10, %v507_v2, %v509_v1  ;;  %v511_v6 = vsel %vm491_vm10, %v509_v1, %v507_v2 }
 0x172   : > { %v513_v9 = vsel %vm425_vm11, %v511_v6, 0.0  ;;  %v514_v10 = vsub.f32 %v504_v4, %v510_v5 }
 0x173   : > { %v515_v13 = vsub.f32 %v502_v8, %v513_v9 }
 0x174   : > { %v518_v17 = vmul.f32 %v514_v10, %v514_v10  ;;  %v593_v18 = vpop.permute.xlu1 %592  ;;  %v591_v19 = vpop.permute.xlu0 %590 }
 0x175   : > { %v519_v22 = vmul.f32 %v515_v13, %v515_v13  ;;  %v595_v23 = vsel %vm478_vm8, %v593_v18, %v591_v19  ;;  %v594_v29 = vsel %vm478_vm8, %v591_v19, %v593_v18  ;;  %v622_v21 = vld [vmem:[%s1338_s12] sm:$0x1] }
 0x176   : > { %v520_v25 = vadd.f32 %v518_v17, %v516_v14  ;;  %v596_v30 = vsel %vm422_vm9, %v595_v23, 0.0 }
 0x177   : > { %v521_v27 = vadd.f32 %v519_v22, %v517_v20  ;;  %v644_v22 = vld [vmem:[%s1345_s20] sm:$0x1] }
 0x178   : > { %v601_v31 = vpop.permute.xlu1 %600  ;;  %v599_v32 = vpop.permute.xlu0 %598  ;;  %vm614_vm13 = vcmp.lt.f32.partialorder %v520_v25, 1.0 }
 0x179   : > { %v602_v33 = vsel %vm491_vm10, %v599_v32, %v601_v31  ;;  %v603_v34 = vsel %vm491_vm10, %v601_v31, %v599_v32  ;;  %vm615_vm14 = vcmp.lt.f32.partialorder %v521_v27, 1.0  ;;  %v616_v36 = vsel %vm614_vm13, 1, %v1006_v35 }
 0x17a   : > { %v605_v37 = vsel %vm425_vm11, %v603_v34, 0.0  ;;  %v606_v38 = vsub.f32 %v596_v30, %v602_v33  ;;  %v617_v39 = vsel %vm615_vm14, 1, %v1006_v35  ;;  %v645_v40 = vsel %vm627_vm12, %v616_v36, 0 }
 0x17b   : > { %v607_v41 = vsub.f32 %v594_v29, %v605_v37  ;;  %v646_v42 = vsel %vm627_vm12, %v617_v39, 0  ;;  %v804_v54 = vsel %vm614_vm13, 1.0, %v1007_v53  ;;  %v805_v56 = vsel %vm615_vm14, 1.0, %v1007_v53 }
 0x17c   : > { %v610_v44 = vmul.f32 %v606_v38, %v606_v38  ;;  %v647_v45 = vadd.s32 %v646_v42, %v645_v40 }
 0x17d   : > { %v611_v46 = vmul.f32 %v607_v41, %v607_v41 }
 0x17e   : > { %v612_v47 = vadd.f32 %v610_v44, %v608_v43  ;;  %v649_v48 = vshrl.u32 %v647_v45, 16  ;;  %v648_v49 = vand.u32 65535, %v647_v45 }
 0x17f   : > { %v613_v50 = vadd.f32 %v611_v46, %v609_v58 }
 0x180   : > { %v651_v51 = vcvt.s32.f32 %v649_v48  ;;  %v650_v59 = vcvt.s32.f32 %v648_v49  ;;  %v620_v52 = vsub.f32 %v520_v25, %v612_v47 }
 0x181   : > { %v621_v55 = vsub.f32 %v521_v27, %v613_v50 }
 0x182   : > { %654 = vadd.xlane.f32.xlu0 %v651_v51  ;;  %652 = vadd.xlane.f32.xlu1 %v650_v59  ;;  %v623_v57 = vmul.f32 %v804_v54, %v620_v52 }
 0x183   : > { %v624_v60 = vmul.f32 %v805_v56, %v621_v55 }
 0x184   : > { %v625_v61 = vmul.f32 %v623_v57, %v620_v52 }
 0x185   : > { %v626_v62 = vmul.f32 %v624_v60, %v621_v55 }
 0x186   : > { %v628_v63 = vsel %vm627_vm12, %v625_v61, 0.0 }
 0x187   : > { %v629_v0 = vsel %vm627_vm12, %v626_v62, 0.0 }
 0x188   : > { %v630_v1 = vadd.f32 %v629_v0, %v628_v63 }
 0x18a   : > { %631 = vadd.xlane.f32.xlu0 %v630_v1 }
 0x20f   : > { %v653_v2 = vpop.xlane.xlu1 %652  ;;  %v655_v3 = vpop.xlane.xlu0 %654 }
 0x210   : > { %v657_v4 = vcvt.f32.s32 %v655_v3  ;;  %v656_v5 = vcvt.f32.s32 %v653_v2 }
 0x212   : > { %v658_v6 = vshll.u32 %v657_v4, 16 }
 0x214   : > { %v659_v7 = vadd.s32 %v658_v6, %v656_v5 }
 0x216   : > { %v660_v8 = vrot.slane %v659_v7, 4 }
 0x217   : > { %v632_v9 = vpop.xlane.xlu0 %631 }
 0x218   : > { %v661_v10 = vadd.s32 %v660_v8, %v659_v7  ;;  %v633_v11 = vrot.slane %v632_v9, 4 }
 0x21a   : > { %v634_v12 = vadd.f32 %v633_v11, %v632_v9  ;;  %v662_v13 = vrot.slane %v661_v10, 2 }
 0x21c   : > { %v635_v14 = vrot.slane %v634_v12, 2  ;;  %v663_v15 = vadd.s32 %v662_v13, %v661_v10 }
 0x21e   : > { %v636_v16 = vadd.f32 %v635_v14, %v634_v12  ;;  %v664_v17 = vrot.slane %v663_v15, 1 }
 0x220   : > { %v637_v18 = vrot.slane %v636_v16, 1  ;;  %v665_v20 = vadd.s32 %v664_v17, %v663_v15 }
 0x222   : > { %v638_v19 = vadd.f32 %v637_v18, %v636_v16 }
 0x224   : > { %810 = vpush %v638_v19 }
 0x225   : > { %812 = vpush %v665_v20 }
 0x255   : > { %s811_s15 = spop %810 }
 0x256   : > { %v640_v23 = vstv %s811_s15  ;;  %s813_s25 = spop %812 }
 0x257   : > { %v641_v24 = vadd.f32 %v640_v23, %v622_v21  ;;  %v667_v25 = vstv %s813_s25 }
 0x258   : > { %v668_v26 = vadd.s32 %v667_v25, %v644_v22 }
 0x259   : > { %643 = vst.msk [vmem:[%s1338_s12] sm:$0x1] %vm335_vm15, %v641_v24 }
 0x25a   : > { %669 = vst.msk [vmem:[%s1345_s20] sm:$0x1] %vm335_vm15, %v668_v26 }
 0x25b PF: > { %s20_s17 = sadd.s32 1, %s997_s17   ;;  %s1394_s12 = smov %s981_s13 }
 0x25c   : > { %p17_p9 = scmp.ge.s32.totalorder %s20_s17, 4   ;;  %s1395_s13 = smov %s985_s14 }
 0x25d   : > { %s1396_s14 = smov %s1077_s24  ;;  %s1397_s15 = smov %s993_s16 }
 0x25e   : > { %s1398_s16 = smov %s1400_s19  ;;  %19 = sbr.rel (!%p17_p9) target bundleno = 6 (0x6), region = 105 }
 0x265   :  { %699 = vsyncpa [#allocation5], 1 }
 0x266   :  { %701 = vsyncpa [#allocation5 + $0x1], 1 }
 0x267   :  { %702 = vsyncpa [#allocation7], 1 }
 0x268   :  { %704 = vsyncpa [#allocation7 + $0x1], 1 }

</bundles_post_ra>
